<compile_context>
chip_gen: v7x
topology: tpu7x:2x2x1
jax: 0.10.0
libtpu: 0.0.40
codegen_flags: <defaults>
</compile_context>

<pallas_src>
import jax
import jax.numpy as jnp
from jax.experimental import pallas as pl
from jax.experimental.pallas import tpu as pltpu  # noqa: F401  (kept for the planned tiled variant)


def _make_mubo_kernel(B, cat_dim, hidden, p_row):
    """Build the kernel with all layout constants baked in as Python ints."""
    two_h = 2 * hidden

    def kernel(zcat_ref, params_ref, out_ref):
        # --- single MXU pass for both first-layer projections (block-diagonal W1) ---
        # cat(zs, zt) @ [[W1x, 0], [0, W1y]] -> [hzs | hzt]
        w1_bd = params_ref[0:cat_dim, :]                                    # (cat_dim, 2h)
        hboth = jnp.dot(zcat_ref[...], w1_bd,
                        preferred_element_type=jnp.float32)                 # (B, 2h)

        b1    = params_ref[cat_dim:cat_dim + 1, 0:hidden]                   # (1, hidden)
        w2row = params_ref[cat_dim:cat_dim + 1, hidden:two_h]               # (1, hidden)
        b2    = params_ref[cat_dim + 1:cat_dim + 2, 0:1]                    # (1, 1)
        perm1 = params_ref[p_row:p_row + B, 0:B]                            # (B, B) one-hot

        hzs_b = hboth[:, 0:hidden] + b1          # bias hoisted, reused by both branches
        hzt   = hboth[:, hidden:two_h]

        # Permutation commutes with the row-wise matmul: gather hzt rows with a one-hot
        # matmul instead of a serialized dynamic-slice loop.
        hzt_s = jnp.dot(perm1, hzt, preferred_element_type=jnp.float32)     # hzt[perm]

        # Both critic branches fused along sublanes: one relu / mul / reduce / sigmoid.
        h_all = jnp.maximum(
            jnp.concatenate([hzs_b + hzt, hzs_b + hzt_s], axis=0), 0.0)     # (2B, hidden)
        f_all = jax.nn.sigmoid(
            jnp.sum(h_all * w2row, axis=-1, keepdims=True) + b2)            # (2B, 1)

        mubo = f_all[0:B, :] - f_all[B:2 * B, :]                            # (B, 1)
        neg  = jnp.minimum(mubo, 0.0)                                       # mubo * (mubo < 0)
        out_ref[...] = jnp.reshape(jnp.mean(mubo) + jnp.mean(neg * neg), (1, 1))

    return kernel


def pack_mubo_params(w1, b1, w2, b2, perm, x_dim):
    """Pack block-diagonal W1, b1, w2, b2 and the one-hot permutation into ONE f32 array.

    Layout (rows):
      [0, cat_dim)            : block_diag(W1x, W1y)            (cat_dim, 2*hidden)
      cat_dim                 : [ b1 | w2^T ]
      cat_dim + 1             : [ b2, 0, ... ]
      [p_row, p_row + B)      : one-hot P in the first B columns (sublane-aligned start)
    """
    cat_dim, hidden = w1.shape
    two_h = 2 * hidden
    B = perm.shape[0]
    assert B <= two_h, "one-hot permutation block must fit in the packed lane width"

    w1_bd = jnp.zeros((cat_dim, two_h), jnp.float32)
    w1_bd = w1_bd.at[:x_dim, :hidden].set(w1[:x_dim])
    w1_bd = w1_bd.at[x_dim:, hidden:].set(w1[x_dim:])

    tail = jnp.zeros((2, two_h), jnp.float32)
    tail = tail.at[0, :hidden].set(jnp.reshape(b1, (-1,)))
    tail = tail.at[0, hidden:].set(jnp.reshape(w2, (-1,)))
    tail = tail.at[1, 0].set(jnp.reshape(b2, ()))

    # One-hot permutation matrix: (P @ h)[i] == h[perm[i]].
    p_row = ((cat_dim + 2 + 7) // 8) * 8                    # sublane-aligned start row
    perm_onehot = jnp.zeros((B, B), jnp.float32).at[jnp.arange(B), perm].set(1.0)
    pad = jnp.zeros((p_row - (cat_dim + 2), two_h), jnp.float32)
    p_block = jnp.zeros((B, two_h), jnp.float32).at[:, :B].set(perm_onehot)

    params = jnp.concatenate([w1_bd, tail, pad, p_block], axis=0)
    return params, p_row


def calculate_mubo_pallas(zcat, params, *, B, cat_dim, hidden, p_row):
    kernel = _make_mubo_kernel(B, cat_dim, hidden, p_row)
    # Grid-less call: whole arrays resident in VMEM, 2 input DMAs + 1 tiny output.
    out = pl.pallas_call(
        kernel,
        out_shape=jax.ShapeDtypeStruct((1, 1), jnp.float32),
    )(zcat, params)
    return out[0, 0]


def _reference(zs, zt, perm, w1, b1, w2, b2):
    zt_shuffle = zt[perm]

    def critic(a, b):
        cat = jnp.concatenate([a, b], axis=-1)
        h = jnp.maximum(cat @ w1 + b1, 0.0)
        return jax.nn.sigmoid(h @ w2 + b2)

    f_st = critic(zs, zt)
    f_s_t = critic(zs, zt_shuffle)
    mubo = f_st - f_s_t
    mask = jnp.where(mubo < 0, 1.0, 0.0)
    reg = jnp.mean((mubo * mask) ** 2)
    return jnp.mean(mubo) + reg


if __name__ == "__main__":
    key = jax.random.PRNGKey(0)
    B, D_in, x_dim, y_dim = 8, 16, 32, 32
    cat_dim = x_dim + y_dim
    hidden = cat_dim // 4

    ks = jax.random.split(key, 8)

    # var_net_s / var_net_t are external modules in the original code; modeled here as
    # deterministic linear projections in plain-JAX glue.
    x_his = jax.random.normal(ks[0], (B, D_in), jnp.float32)
    w_s = jax.random.normal(ks[1], (D_in, x_dim), jnp.float32) / jnp.sqrt(D_in)
    w_t = jax.random.normal(ks[2], (D_in, y_dim), jnp.float32) / jnp.sqrt(D_in)

    # Single pre-concatenated activation: zcat == concat(zs, zt) == x_his @ [w_s | w_t].
    zcat = x_his @ jnp.concatenate([w_s, w_t], axis=1)

    # torch.randperm -> deterministic jax permutation; applied inside the kernel via a
    # one-hot permutation matmul (no zt_shuffle materialization, no dynamic indexing).
    perm = jax.random.permutation(ks[3], B).astype(jnp.int32)

    # CriticFunc parameters: Linear(cat_dim, cat_dim//4) and Linear(cat_dim//4, 1),
    # nn.Linear-style uniform(-1/sqrt(fan_in), 1/sqrt(fan_in)) init, deterministic.
    lim1 = 1.0 / jnp.sqrt(cat_dim)
    lim2 = 1.0 / jnp.sqrt(hidden)
    w1 = jax.random.uniform(ks[4], (cat_dim, hidden), jnp.float32, -lim1, lim1)
    b1 = jax.random.uniform(ks[5], (1, hidden), jnp.float32, -lim1, lim1)
    w2 = jax.random.uniform(ks[6], (hidden, 1), jnp.float32, -lim2, lim2)
    b2 = jax.random.uniform(ks[7], (1, 1), jnp.float32, -lim2, lim2)

    params, p_row = pack_mubo_params(w1, b1, w2, b2, perm, x_dim)

    out = calculate_mubo_pallas(zcat, params, B=B, cat_dim=cat_dim, hidden=hidden, p_row=p_row)
    out = jax.block_until_ready(out)

    zs = x_his @ w_s
    zt = x_his @ w_t
    ref = _reference(zs, zt, perm, w1, b1, w2, b2)
    assert jnp.allclose(out, ref, atol=1e-5, rtol=1e-5), (out, ref)
    print("KERNEL_OK")
</pallas_src>

<mosaic_0001>
module attributes {stable_mosaic.version = 11 : i64} {
  func.func @kernel(%arg0: memref<8x64xf32, #tpu.memory_space<vmem>>, %arg1: memref<80x32xf32, #tpu.memory_space<vmem>>, %arg2: memref<1x1xf32, #tpu.memory_space<vmem>>) attributes {dimension_semantics = [], scalar_prefetch = 0 : i64, scratch_operands = 0 : i64, tpu.core_type = #tpu.core_type<tc>} {
    %c0 = arith.constant 0 : index
    %c0_0 = arith.constant 0 : index
    %0 = vector.load %arg1[%c0, %c0_0] : memref<80x32xf32, #tpu.memory_space<vmem>>, vector<64x32xf32>
    %c0_1 = arith.constant 0 : index
    %c0_2 = arith.constant 0 : index
    %1 = vector.load %arg0[%c0_1, %c0_2] : memref<8x64xf32, #tpu.memory_space<vmem>>, vector<8x64xf32>
    %cst = arith.constant dense<0.000000e+00> : vector<8x32xf32>
    %2 = tpu.matmul %1, %0, %cst {dimension_numbers = #tpu.dot_dimension_numbers<[1], [0], [0], [1], [0, 0, 1, 1], [], []>} : vector<8x64xf32>, vector<64x32xf32>, vector<8x32xf32> -> vector<8x32xf32>
    %c64 = arith.constant 64 : index
    %c0_3 = arith.constant 0 : index
    %3 = vector.load %arg1[%c64, %c0_3] : memref<80x32xf32, #tpu.memory_space<vmem>>, vector<1x16xf32>
    %c64_4 = arith.constant 64 : index
    %c16 = arith.constant 16 : index
    %4 = vector.load %arg1[%c64_4, %c16] : memref<80x32xf32, #tpu.memory_space<vmem>>, vector<1x16xf32>
    %c65 = arith.constant 65 : index
    %c0_5 = arith.constant 0 : index
    %5 = vector.load %arg1[%c65, %c0_5] : memref<80x32xf32, #tpu.memory_space<vmem>>, vector<1x1xf32>
    %c72 = arith.constant 72 : index
    %c0_6 = arith.constant 0 : index
    %6 = vector.load %arg1[%c72, %c0_6] : memref<80x32xf32, #tpu.memory_space<vmem>>, vector<8x8xf32>
    %7 = vector.extract_strided_slice %2 {offsets = [0, 0], sizes = [8, 16], strides = [1, 1]} : vector<8x32xf32> to vector<8x16xf32>
    %8 = vector.broadcast %3 : vector<1x16xf32> to vector<8x16xf32>
    %9 = arith.addf %7, %8 : vector<8x16xf32>
    %10 = vector.extract_strided_slice %2 {offsets = [0, 16], sizes = [8, 16], strides = [1, 1]} : vector<8x32xf32> to vector<8x16xf32>
    %cst_7 = arith.constant dense<0.000000e+00> : vector<8x16xf32>
    %11 = tpu.matmul %6, %10, %cst_7 {dimension_numbers = #tpu.dot_dimension_numbers<[1], [0], [0], [1], [0, 0, 1, 1], [], []>} : vector<8x8xf32>, vector<8x16xf32>, vector<8x16xf32> -> vector<8x16xf32>
    %12 = arith.addf %9, %10 : vector<8x16xf32>
    %13 = arith.addf %9, %11 : vector<8x16xf32>
    %14 = tpu.concatenate %12, %13 in 0 : vector<8x16xf32>, vector<8x16xf32> -> vector<16x16xf32>
    %cst_8 = arith.constant 0.000000e+00 : f32
    %15 = vector.broadcast %cst_8 : f32 to vector<16x16xf32>
    %16 = arith.maximumf %14, %15 : vector<16x16xf32>
    %17 = vector.broadcast %4 : vector<1x16xf32> to vector<16x16xf32>
    %18 = arith.mulf %16, %17 : vector<16x16xf32>
    %cst_9 = arith.constant dense<0.000000e+00> : vector<16xf32>
    %19 = vector.multi_reduction <add>, %18, %cst_9 [1] : vector<16x16xf32> to vector<16xf32>
    %20 = vector.shape_cast %19 : vector<16xf32> to vector<16x1xf32>
    %21 = vector.broadcast %5 : vector<1x1xf32> to vector<16x1xf32>
    %22 = arith.addf %20, %21 : vector<16x1xf32>
    %23 = arith.negf %22 : vector<16x1xf32>
    %24 = math.exp %23 : vector<16x1xf32>
    %cst_10 = arith.constant 1.000000e+00 : f32
    %25 = vector.broadcast %cst_10 : f32 to vector<16x1xf32>
    %26 = arith.addf %25, %24 : vector<16x1xf32>
    %27 = arith.divf %25, %26 : vector<16x1xf32>
    %28 = vector.extract_strided_slice %27 {offsets = [0, 0], sizes = [8, 1], strides = [1, 1]} : vector<16x1xf32> to vector<8x1xf32>
    %29 = vector.extract_strided_slice %27 {offsets = [8, 0], sizes = [8, 1], strides = [1, 1]} : vector<16x1xf32> to vector<8x1xf32>
    %30 = arith.subf %28, %29 : vector<8x1xf32>
    %cst_11 = arith.constant 0.000000e+00 : f32
    %31 = vector.broadcast %cst_11 : f32 to vector<8x1xf32>
    %32 = arith.minimumf %30, %31 : vector<8x1xf32>
    %33 = vector.shape_cast %30 : vector<8x1xf32> to vector<1x8x1xf32>
    %cst_12 = arith.constant dense<0.000000e+00> : vector<1xf32>
    %34 = vector.multi_reduction <add>, %33, %cst_12 [1, 2] : vector<1x8x1xf32> to vector<1xf32>
    %35 = vector.shape_cast %34 : vector<1xf32> to vector<1x1x1xf32>
    %36 = vector.extract %35[0, 0, 0] : f32 from vector<1x1x1xf32>
    %cst_13 = arith.constant 8.000000e+00 : f32
    %37 = arith.divf %36, %cst_13 : f32
    %38 = arith.mulf %32, %32 : vector<8x1xf32>
    %39 = vector.shape_cast %38 : vector<8x1xf32> to vector<1x8x1xf32>
    %cst_14 = arith.constant dense<0.000000e+00> : vector<1xf32>
    %40 = vector.multi_reduction <add>, %39, %cst_14 [1, 2] : vector<1x8x1xf32> to vector<1xf32>
    %41 = vector.shape_cast %40 : vector<1xf32> to vector<1x1x1xf32>
    %42 = vector.extract %41[0, 0, 0] : f32 from vector<1x1x1xf32>
    %cst_15 = arith.constant 8.000000e+00 : f32
    %43 = arith.divf %42, %cst_15 : f32
    %44 = arith.addf %37, %43 : f32
    %45 = vector.broadcast %44 : f32 to vector<1x1xf32>
    %c0_16 = arith.constant 0 : index
    %c0_17 = arith.constant 0 : index
    %46 = vector.load %arg2[%c0_16, %c0_17] : memref<1x1xf32, #tpu.memory_space<vmem>>, vector<1x1xf32>
    tpu.vector_store %arg2[%c0_16, %c0_17], %45 {strides = array<i32>} : memref<1x1xf32, #tpu.memory_space<vmem>>, vector<1x1xf32>,
    return
  }
}

</mosaic_0001>

<bundles_post_ra>
// kernel: tpu_custom_call.1
= control target key start
LH: loop header
LB: loop body
LE: loop exit
PB: predicated region body
PF: predicated region fallthrough
CT: control target
= control target key end

     0   :  { %v358_v3 = vmov 0.0|0.0   ;;  %vm359_vm0 = vmmov 0   ;;  %v360_v6 = vmov 0.0   ;;  %s426_s0 = inlined_call_operand.vmem [shape: f32[8,64], index: 0, kind: input, shape index: {}]   ;;  %s427_s1 = inlined_call_operand.vmem [shape: f32[80,32], index: 1, kind: input, shape index: {}]   ;;  %s428_s2 = inlined_call_operand.hbm [shape: f32[1,1], index: 2, kind: output, shape index: {}]  }
   0x1   :  { %v12_v0 = vld [vmem:[%s427_s1] sm:$0xff]  ;;  %v13_v1 = vld [vmem:[%s427_s1 + $0x8] sm:$0xff]  ;;  %v14_v2 = vld [vmem:[%s427_s1 + $0x10] sm:$0xff]  ;;  %305 = vmatprep.subr.bf16.mxu0 %v358_v3  ;;  %297 = vmatprep.mubr.msk.f32.mxu0 %vm359_vm0, %v360_v6 }
   0x2   :  { %v306_v4 = vpack.c.bf16 %v13_v1, %v12_v0  ;;  %v15_v5 = vld [vmem:[%s427_s1 + $0x18] sm:$0xff]  ;;  %300 = vmatprep.subr.mxu1 %v360_v6  ;;  %302 = vmatprep.mubr.msk.f32.mxu1 %vm359_vm0, %v360_v6 }
   0x3   :  { %v309_v7 = vpack.c.bf16 %v15_v5, %v14_v2 }
   0x4   :  { %307 = vmatpush3.bf16.msra.mxu0 %v306_v4 }
   0x5   :  { %7 = vsyncpa [#allocation3], 0  ;;  %308 = vmatprep.subr.bf16.mxu0 %v358_v3  ;;  %v16_v8 = vld [vmem:[%s427_s1 + $0x20] sm:$0xff]  ;;  %v17_v9 = vld [vmem:[%s427_s1 + $0x28] sm:$0xff]  ;;  %vm21_vm1 = vcmask 523264   ;;  %s361_s29 = smov 112  }
   0x6   :  { %v312_v10 = vpack.c.bf16 %v17_v9, %v16_v8  ;;  %v18_v11 = vld [vmem:[%s427_s1 + $0x30] sm:$0xff]  ;;  %v19_v12 = vld [vmem:[%s427_s1 + $0x38] sm:$0xff]  ;;  %v20_v14 = vld [vmem:[%s426_s0] sm:$0xff]  ;;  %vm107_vm2 = vcmask 64512   ;;  %vm191_vm3 = vcmask 130048   ;;  %vm218_vm4 = vcmask 7168  }
   0x7   :  { %v315_v13 = vpack.c.bf16 %v19_v12, %v18_v11  ;;  %v265_v15 = vld [vmem:[%s427_s1 + $0x40] ss:$0 sm:$0xff]  ;;  %v97_v19 = vld [vmem:[%s427_s1 + $0x48] sm:$0xff]  ;;  %v267_v32 = vld [vmem:[%s427_s1 + $0x41] ss:$0 sm:$0xff]  ;;  %s362_s8 = smov [#allocation2]  }
   0x8   :  { %310 = vmatpush3.bf16.msra.mxu0 %v309_v7  ;;  %s256_s9 = sshll.u32 %s362_s8, 4  ;;  %vm248_vm5 = vcmask 0   ;;  %s257_s9 = int_to_ptr.vmem [resolvable:$true] %s256_s9 }
   0x9   :  { %311 = vmatprep.subr.bf16.mxu0 %v358_v3  ;;  %s334_s11 = scalar_lea.vmem %s257_s9, 16  ;;  %s338_s12 = scalar_lea.vmem %s257_s9, 32 }
   0xa   :  { %p335_p0 = scmp.ne.s32.totalorder %s257_s9, %s334_s11  ;;  %p339_p1 = scmp.lt.s32.totalorder %s257_s9, %s257_s9 }
   0xb   :  { %p340_p2 = scmp.lt.s32.totalorder %s338_s12, %s334_s11 }
   0xc   :  { %313 = vmatpush3.bf16.msra.mxu0 %v312_v10 }
   0xd   :  { %314 = vmatprep.subr.bf16.mxu0 %v358_v3  ;;  %p341_p3 = por %p340_p2, %p339_p1 }
   0xf   :  { %p342_p4 = pnand %p341_p3, %p335_p0 }
  0x10   :  { %316 = vmatpush3.bf16.msra.mxu0 %v315_v13 }
  0x13   :  { %298 = vmatmul.mubr.msk.f32.vlgmr.msra.gmra.mrb[0].mxu0 %vm21_vm1, %v20_v14 }
  0xe6   :  { %v91_v16 = vpop.f32.mrb[0].mxu0 }
  0xe7   :  { %v102_v17 = vadd.f32 %v265_v15, %v91_v16  ;;  %104 = vrot.lane.b32.xlu0 %v91_v16, %s361_s29  ;;  %v299_v18 = vpop.f32.mrb[1].mxu0 }
  0xeb   :  { %186 = vrot.lane.b32.xlu0 %v265_v15, %s361_s29 }
 0x159   :  { %v105_v20 = vpop.permute.xlu0 %104 }
 0x15a   :  { %v181_v21 = vadd.f32 %v105_v20, %v102_v17  ;;  %301 = vmatpush3.msra.mxu1 %v105_v20 }
 0x15b   :  { %303 = vmatmul.mubr.msk.f32.vlgmr.msra.gmra.mrb[0].mxu1 %vm107_vm2, %v97_v19 }
 0x15c   :  { %v183_v22 = vmax.f32 %v181_v21, 0.0 }
 0x15d   :  { %v187_v23 = vpop.permute.xlu0 %186 }
 0x15e   :  { %v189_v24 = vmul.f32 %v187_v23, %v183_v22 }
 0x160   :  { %v192_v25 = vsel %vm191_vm3, %v189_v24, 0.0 }
 0x161   :  { %193 = vadd.xlane.f32.xlu1 %v192_v25 }
 0x1ee   :  { %v194_v33 = vpop.xlane.xlu1 %193 }
 0x1ef   :  { %v202_v34 = vadd.f32 %v267_v32, %v194_v33 }
 0x1f1   :  { %v268_v35 = vmul.f32 -1.442695, %v202_v34 }
 0x1f3   :  { %326 = vpow2.f32 %v268_v35 }
 0x1fd   :  { %v327_v39 = vpop.eup %326 }
 0x1fe   :  { %v210_v40 = vadd.f32 1.0, %v327_v39 }
 0x22e   :  { %v177_v26 = vpop.f32.mrb[0].mxu1 }
 0x22f   :  { %v182_v27 = vadd.f32 %v177_v26, %v102_v17  ;;  %v304_v28 = vpop.f32.mrb[1].mxu1 }
 0x231   :  { %v184_v29 = vmax.f32 %v182_v27, 0.0 }
 0x233   :  { %v190_v30 = vmul.f32 %v187_v23, %v184_v29 }
 0x235   :  { %v195_v31 = vsel %vm191_vm3, %v190_v30, 0.0 }
 0x236   :  { %196 = vadd.xlane.f32.xlu1 %v195_v31 }
 0x2c3   :  { %v197_v36 = vpop.xlane.xlu1 %196 }
 0x2c4   :  { %v203_v37 = vadd.f32 %v267_v32, %v197_v36 }
 0x2c6   :  { %v269_v38 = vmul.f32 -1.442695, %v203_v37 }
 0x2c8   :  { %328 = vpow2.f32 %v269_v38 }
 0x2c9   :  { %330 = vrcp.f32 %v210_v40 }
 0x2d2   :  { %v329_v41 = vpop.eup %328 }
 0x2d3   :  { %v211_v42 = vadd.f32 1.0, %v329_v41  ;;  %v331_v43 = vpop.eup %330 }
 0x2d5   :  { %332 = vrcp.f32 %v211_v42 }
 0x2df   :  { %v333_v44 = vpop.eup %332 }
 0x2e0   :  { %v216_v45 = vsub.f32 %v331_v43, %v333_v44 }
 0x2e2   :  { %v219_v46 = vsel %vm218_vm4, %v216_v45, 0.0  ;;  %v217_v47 = vmin.f32 %v216_v45, 0.0 }
 0x2e3   :  { %220 = vadd.xlane.f32.xlu0 %v219_v46 }
 0x2e4   :  { %v232_v48 = vmul.f32 %v217_v47, %v217_v47 }
 0x2e6   :  { %v233_v49 = vsel %vm218_vm4, %v232_v48, 0.0 }
 0x2e7   :  { %234 = vadd.xlane.f32.xlu1 %v233_v49 }
 0x370   :  { %v221_v50 = vpop.xlane.xlu0 %220 }
 0x371   :  { %v222_v51 = vrot.slane %v221_v50, 4 }
 0x373   :  { %v223_v52 = vadd.f32 %v222_v51, %v221_v50 }
 0x374   :  { %v235_v53 = vpop.xlane.xlu1 %234 }
 0x375   :  { %v224_v54 = vrot.slane %v223_v52, 2  ;;  %v236_v55 = vrot.slane %v235_v53, 4 }
 0x377   :  { %v237_v56 = vadd.f32 %v236_v55, %v235_v53  ;;  %v225_v57 = vadd.f32 %v224_v54, %v223_v52 }
 0x379   :  { %v238_v58 = vrot.slane %v237_v56, 2  ;;  %v226_v59 = vrot.slane %v225_v57, 1 }
 0x37b   :  { %v239_v60 = vadd.f32 %v238_v58, %v237_v56  ;;  %v227_v61 = vadd.f32 %v226_v59, %v225_v57 }
 0x37d   :  { %317 = vpush %v227_v61  ;;  %v240_v62 = vrot.slane %v239_v60, 1 }
 0x37f   :  { %v241_v63 = vadd.f32 %v240_v62, %v239_v60 }
 0x381   :  { %319 = vpush %v241_v63 }
 0x3ae   :  { %s318_s1 = spop %317 }
 0x3af   :  { %s231_s5 = smul.f32 0.125, %s318_s1 }
 0x3b2   :  { %s320_s6 = spop %319 }
 0x3b3   :  { %s245_s7 = smul.f32 0.125, %s320_s6 }
 0x3b5   :  { %s246_s10 = sadd.f32 %s245_s7, %s231_s5 }
 0x3b7   :  { %v247_v0 = vstv %s246_s10 }
 0x3b8   :  { %249 = vst.msk [vmem:[#allocation2] sm:$0x1] %vm248_vm5, %v247_v0 }
 0x3b9   :  { %345 = shalt.err (!%p342_p4)
}
 0x3ba   :  { %s346_s15 = scalar_lea.hbm %s428_s2, 16 }
 0x3bb   :  { %p347_p5 = scmp.ne.s32.totalorder %s428_s2, %s346_s15  ;;  %p350_p6 = scmp.lt.u32.totalorder %s346_s15, %s428_s2 }
 0x3bd   :  { %p352_p7 = pnand %p350_p6, %p347_p5 }
 0x3bf   :  { %355 = shalt.err (!%p352_p7)
}
 0x3c0   :  { %259 = dma.vmem_to_hbm [thread:$0]  %s257_s9, 16, %s428_s2, [#allocation3]  }
 0x3c1   :  { %356 = dma.done.wait [#allocation3], 16  }
 0x3c2   :  { %357 = vsyncadd [#allocation3], 4294967280 }
 0x3c3   :  { %263 = vsyncpa [#allocation3], 1 }

</bundles_post_ra>
